<compile_context>
chip_gen: v6e
topology: v6e:2x2x1
jax: 0.10.0
libtpu: 0.0.40
codegen_flags: <defaults>
</compile_context>

<pallas_src>
import functools

import jax
import jax.numpy as jnp
from jax.experimental import pallas as pl
from jax.experimental.pallas import tpu as pltpu


# ----------------------------- Pallas kernel ------------------------------- #
def _denoiser_mlp_kernel(z_ref, t_ref, w1z_ref, w1t_ref, b1_ref,
                         w2_ref, b2_ref, out_ref):
    """Token-wise 2-layer MLP + uncertainty head, one lane-dense output slab.

    z_ref   : (TM, D)     bf16 token tile (z_t features only)
    t_ref   : (TM, 1)     f32 time channel
    w1z_ref : (D, H)      bf16, resident
    w1t_ref : (1, H)      f32 time row of W1
    b1_ref  : (1, H)      f32
    w2_ref  : (H, 2*D)    bf16, resident; logvar half pre-scaled by 0.5
    b2_ref  : (1, 2*D)    f32;             logvar half pre-scaled by 0.5
    out_ref : (TM, 2*D)   f32 = [mean_theta | sigma_theta]
    """
    # MXU matmul (bf16 feed, f32 accumulate); time channel as a rank-1 VPU update.
    h = jnp.dot(z_ref[...], w1z_ref[...], preferred_element_type=jnp.float32)
    h = h + t_ref[...] * w1t_ref[...] + b1_ref[...]
    # tanh-approx GELU (EUP-friendly); synthetic denoiser is defined with this form.
    h = jax.nn.gelu(h, approximate=True)

    out = jnp.dot(h.astype(w2_ref.dtype), w2_ref[...],
                  preferred_element_type=jnp.float32) + b2_ref[...]

    # sigma = exp(0.5*logvar) == exp(head) since the head is pre-scaled by 0.5.
    # exp over the whole slab runs on the otherwise-idle EUP; a cheap VPU select
    # keeps the mean half linear.  No lane slicing, single lane-dense store.
    d = out_ref.shape[-1] // 2
    col = jax.lax.broadcasted_iota(jnp.int32, out.shape, 1)
    out_ref[...] = jnp.where(col >= d, jnp.exp(out), out)


def _run_denoiser_mlp(z_flat, t_flat, w1_z, w1_t, b1, w2, b2, *, tile_cap=1024):
    """z_flat: (N, D) bf16, t_flat: (N, 1) f32 -> (N, 2*D) f32 [mean | sigma]."""
    n, d = z_flat.shape
    h = w1_z.shape[1]
    two_d = w2.shape[1]

    # Generation-aware tiling: one big tile if it fits (grid of 1 for small N),
    # otherwise tile_cap-row tiles (multiple of 16 for bf16 sublane packing) with
    # the tail padded.  Per-grid-step overhead is ~0.35us, so bigger is better;
    # at realistic sizes each tile is still far below any VMEM limit
    # (tokens tile @ 1024 x D bf16 + output @ 1024 x 2D f32 is only a few hundred KiB).
    tile_m = n if n <= tile_cap else tile_cap
    n_pad = ((n + tile_m - 1) // tile_m) * tile_m
    if n_pad != n:
        z_flat = jnp.pad(z_flat, ((0, n_pad - n), (0, 0)))
        t_flat = jnp.pad(t_flat, ((0, n_pad - n), (0, 0)))

    grid = (n_pad // tile_m,)

    # Advisory: this kernel is overhead/store-bound (K=16, N=32 is mostly MXU padding).
    cost = pl.CostEstimate(
        flops=2 * n_pad * (d * h + h * two_d),
        transcendentals=n_pad * (h + two_d),          # gelu-tanh + exp
        bytes_accessed=(z_flat.size * z_flat.dtype.itemsize
                        + t_flat.size * t_flat.dtype.itemsize
                        + w1_z.size * w1_z.dtype.itemsize
                        + w2.size * w2.dtype.itemsize
                        + (w1_t.size + b1.size + b2.size) * 4
                        + n_pad * two_d * 4),
    )

    packed = pl.pallas_call(
        _denoiser_mlp_kernel,
        out_shape=jax.ShapeDtypeStruct((n_pad, two_d), jnp.float32),
        grid_spec=pltpu.PrefetchScalarGridSpec(
            num_scalar_prefetch=0,
            grid=grid,
            in_specs=[
                pl.BlockSpec((tile_m, d), lambda i: (i, 0)),    # z tokens (bf16)
                pl.BlockSpec((tile_m, 1), lambda i: (i, 0)),    # time column (f32)
                pl.BlockSpec((d, h), lambda i: (0, 0)),         # W1_z (resident)
                pl.BlockSpec((1, h), lambda i: (0, 0)),         # w1_t row
                pl.BlockSpec((1, h), lambda i: (0, 0)),         # b1
                pl.BlockSpec((h, two_d), lambda i: (0, 0)),     # W2 [mean | 0.5*logvar]
                pl.BlockSpec((1, two_d), lambda i: (0, 0)),     # b2
            ],
            out_specs=pl.BlockSpec((tile_m, two_d), lambda i: (i, 0)),
        ),
        compiler_params=pltpu.CompilerParams(
            dimension_semantics=("parallel",),   # shards grid across TCs on v7x
        ),
        cost_estimate=cost,
    )(z_flat, t_flat, w1_z, w1_t, b1, w2, b2)

    return packed[:n]


# --------------------------- DenoisingModel glue ---------------------------- #
class DenoisingModelPallas:
    """JAX/Pallas re-implementation of DenoisingModel.forward (sample=False path)."""

    def __init__(self, dim, hidden, key,
                 time_interval=(0.0, 1.0),
                 learn_uncertainty=True,
                 use_scaled_logsnr=False):
        self.dim = dim
        self.hidden = hidden
        self.time_interval = time_interval
        self.learn_uncertainty = learn_uncertainty
        self.use_scaled_logsnr = use_scaled_logsnr

        d_in = dim + 1  # z_t features + time channel (tokenizer packing)
        k1, k2, k3, k4 = jax.random.split(key, 4)
        s1 = 1.0 / jnp.sqrt(d_in)
        s2 = 1.0 / jnp.sqrt(hidden)
        w1 = jax.random.uniform(k1, (d_in, hidden), jnp.float32, -s1, s1)
        b1 = jax.random.uniform(k2, (1, hidden), jnp.float32, -s1, s1)
        w2 = jax.random.uniform(k3, (hidden, 2 * dim), jnp.float32, -s2, s2)
        b2 = jax.random.uniform(k4, (1, 2 * dim), jnp.float32, -s2, s2)

        # Split W1 into z-block + time row (tokenizer concat folded into a rank-1
        # update inside the kernel).  Pre-scale the logvar head by 0.5 so the kernel
        # computes sigma_theta = exp(head) directly.  Matmul operands in bf16.
        self.w1_z = w1[:dim].astype(jnp.bfloat16)     # (D, H)
        self.w1_t = w1[dim:dim + 1]                   # (1, H) f32
        self.b1 = b1                                  # (1, H) f32
        head_scale = jnp.concatenate(
            [jnp.ones((dim,), jnp.float32), jnp.full((dim,), 0.5, jnp.float32)])
        self.w2 = (w2 * head_scale).astype(jnp.bfloat16)   # (H, 2D)
        self.b2 = b2 * head_scale                          # (1, 2D) f32

    def _adjust_time(self, t):
        t_min, t_max = self.time_interval
        return t * (t_max - t_min) + t_min  # identity for [0, 1]

    @functools.partial(jax.jit, static_argnums=(0,))
    def forward(self, z_t, t):
        """z_t: [B, T, V, D] float32, t: [B, T, V] float32."""
        b, nt, nv, d = z_t.shape
        assert d == self.dim

        # flow.adjust_time / (optionally) scaled logsnr
        t_flow_adjusted = self._adjust_time(t)
        t_input = t_flow_adjusted  # use_scaled_logsnr = False

        # tokenizer.variables_to_model_inputs: flatten tokens; time channel is
        # kept as a separate column (no HBM-materialized concat).
        n = b * nt * nv
        z_flat = z_t.reshape(n, d).astype(jnp.bfloat16)
        t_flat = t_input.reshape(n, 1).astype(jnp.float32)

        # denoiser.forward_compiled -> Pallas MLP kernel (hot path)
        packed = _run_denoiser_mlp(
            z_flat, t_flat, self.w1_z, self.w1_t, self.b1, self.w2, self.b2)

        # tokenizer.model_outputs_to_variable_predictions (split in the wrapper;
        # the kernel's output slab is [mean | sigma]).
        mean_theta = packed[:, :d].reshape(b, nt, nv, d)
        sigma_theta = (packed[:, d:].reshape(b, nt, nv, d)
                       if self.learn_uncertainty else None)

        # flow.get_ut(t=t_expanded, zt=z_t, ut=mean_theta) == mean_theta
        # (parameterization == denoiser_parameterization == 'ut')
        variance_theta = None  # learn_variance = False
        return {"mean_theta": mean_theta,
                "variance_theta": variance_theta,
                "sigma_theta": sigma_theta}


# ------------------------------ pure-JAX ref -------------------------------- #
def _reference(model, z_t, t):
    b, nt, nv, d = z_t.shape
    n = b * nt * nv
    z = z_t.reshape(n, d).astype(jnp.bfloat16)
    tt = t.reshape(n, 1).astype(jnp.float32)
    h = jnp.dot(z, model.w1_z, preferred_element_type=jnp.float32)
    h = h + tt * model.w1_t + model.b1
    h = jax.nn.gelu(h, approximate=True)
    out = jnp.dot(h.astype(jnp.bfloat16), model.w2,
                  preferred_element_type=jnp.float32) + model.b2
    mean = out[:, :d].reshape(b, nt, nv, d)
    sigma = jnp.exp(out[:, d:]).reshape(b, nt, nv, d)
    return mean, sigma


# ---------------------------------- main ------------------------------------ #
if __name__ == "__main__":
    key = jax.random.PRNGKey(0)
    k_model, k_z, k_t = jax.random.split(key, 3)

    B, T, V, D, H = 2, 2, 8, 16, 32   # batch, time, num_variables, dim, hidden
    model = DenoisingModelPallas(dim=D, hidden=H, key=k_model)

    z_t = jax.random.normal(k_z, (B, T, V, D), jnp.float32)
    t = jax.random.uniform(k_t, (B, T, V), jnp.float32)

    out = model.forward(z_t, t)
    jax.block_until_ready(out["mean_theta"])
    jax.block_until_ready(out["sigma_theta"])

    assert out["mean_theta"].shape == (B, T, V, D)
    assert out["sigma_theta"].shape == (B, T, V, D)
    assert bool(jnp.all(out["sigma_theta"] > 0.0))
    assert out["variance_theta"] is None

    ref_mean, ref_sigma = _reference(model, z_t, t)
    assert bool(jnp.allclose(out["mean_theta"], ref_mean, rtol=1e-2, atol=1e-2))
    assert bool(jnp.allclose(out["sigma_theta"], ref_sigma, rtol=1e-2, atol=1e-2))

    print("KERNEL_OK")
</pallas_src>

<mosaic_0001>
module attributes {stable_mosaic.version = 11 : i64} {
  func.func @_denoiser_mlp_kernel(%arg0: i32, %arg1: memref<32x16xbf16, #tpu.memory_space<vmem>>, %arg2: memref<32x1xf32, #tpu.memory_space<vmem>>, %arg3: memref<16x32xbf16, #tpu.memory_space<vmem>>, %arg4: memref<1x32xf32, #tpu.memory_space<vmem>>, %arg5: memref<1x32xf32, #tpu.memory_space<vmem>>, %arg6: memref<32x32xbf16, #tpu.memory_space<vmem>>, %arg7: memref<1x32xf32, #tpu.memory_space<vmem>>, %arg8: memref<32x32xf32, #tpu.memory_space<vmem>>) attributes {dimension_semantics = [#tpu.dimension_semantics<parallel>], iteration_bounds = array<i64: 1>, scalar_prefetch = 0 : i64, scratch_operands = 0 : i64, tpu.core_type = #tpu.core_type<tc>, window_params = [{transform_indices = @transform_0, window_bounds = array<i64: 32, 16>}, {transform_indices = @transform_1, window_bounds = array<i64: 32, 1>}, {pipeline_mode = #tpu.pipeline_mode<synchronous>, transform_indices = @transform_2, window_bounds = array<i64: 16, 32>}, {pipeline_mode = #tpu.pipeline_mode<synchronous>, transform_indices = @transform_3, window_bounds = array<i64: 1, 32>}, {pipeline_mode = #tpu.pipeline_mode<synchronous>, transform_indices = @transform_4, window_bounds = array<i64: 1, 32>}, {pipeline_mode = #tpu.pipeline_mode<synchronous>, transform_indices = @transform_5, window_bounds = array<i64: 32, 32>}, {pipeline_mode = #tpu.pipeline_mode<synchronous>, transform_indices = @transform_6, window_bounds = array<i64: 1, 32>}, {transform_indices = @transform_7, window_bounds = array<i64: 32, 32>}]} {
    %c0 = arith.constant 0 : index
    %c0_0 = arith.constant 0 : index
    %0 = vector.load %arg1[%c0, %c0_0] : memref<32x16xbf16, #tpu.memory_space<vmem>>, vector<32x16xbf16>
    %c0_1 = arith.constant 0 : index
    %c0_2 = arith.constant 0 : index
    %1 = vector.load %arg3[%c0_1, %c0_2] : memref<16x32xbf16, #tpu.memory_space<vmem>>, vector<16x32xbf16>
    %cst = arith.constant dense<0.000000e+00> : vector<32x32xf32>
    %2 = tpu.matmul %0, %1, %cst {dimension_numbers = #tpu.dot_dimension_numbers<[1], [0], [0], [1], [0, 0, 1, 1], [], []>} : vector<32x16xbf16>, vector<16x32xbf16>, vector<32x32xf32> -> vector<32x32xf32>
    %c0_3 = arith.constant 0 : index
    %c0_4 = arith.constant 0 : index
    %3 = vector.load %arg2[%c0_3, %c0_4] : memref<32x1xf32, #tpu.memory_space<vmem>>, vector<32x1xf32>
    %c0_5 = arith.constant 0 : index
    %c0_6 = arith.constant 0 : index
    %4 = vector.load %arg4[%c0_5, %c0_6] : memref<1x32xf32, #tpu.memory_space<vmem>>, vector<1x32xf32>
    %5 = vector.broadcast %3 : vector<32x1xf32> to vector<32x32xf32>
    %6 = vector.broadcast %4 : vector<1x32xf32> to vector<32x32xf32>
    %7 = arith.mulf %5, %6 : vector<32x32xf32>
    %8 = arith.addf %2, %7 : vector<32x32xf32>
    %c0_7 = arith.constant 0 : index
    %c0_8 = arith.constant 0 : index
    %9 = vector.load %arg5[%c0_7, %c0_8] : memref<1x32xf32, #tpu.memory_space<vmem>>, vector<1x32xf32>
    %10 = vector.broadcast %9 : vector<1x32xf32> to vector<32x32xf32>
    %11 = arith.addf %8, %10 : vector<32x32xf32>
    %12 = arith.mulf %11, %11 : vector<32x32xf32>
    %13 = arith.mulf %11, %12 : vector<32x32xf32>
    %cst_9 = arith.constant 4.471500e-02 : f32
    %14 = vector.broadcast %cst_9 : f32 to vector<32x32xf32>
    %15 = arith.mulf %14, %13 : vector<32x32xf32>
    %16 = arith.addf %11, %15 : vector<32x32xf32>
    %cst_10 = arith.constant 0.797884583 : f32
    %17 = vector.broadcast %cst_10 : f32 to vector<32x32xf32>
    %18 = arith.mulf %17, %16 : vector<32x32xf32>
    %19 = math.tanh %18 : vector<32x32xf32>
    %cst_11 = arith.constant 1.000000e+00 : f32
    %20 = vector.broadcast %cst_11 : f32 to vector<32x32xf32>
    %21 = arith.addf %20, %19 : vector<32x32xf32>
    %cst_12 = arith.constant 5.000000e-01 : f32
    %22 = vector.broadcast %cst_12 : f32 to vector<32x32xf32>
    %23 = arith.mulf %22, %21 : vector<32x32xf32>
    %24 = arith.mulf %11, %23 : vector<32x32xf32>
    %25 = arith.truncf %24 : vector<32x32xf32> to vector<32x32xbf16>
    %c0_13 = arith.constant 0 : index
    %c0_14 = arith.constant 0 : index
    %26 = vector.load %arg6[%c0_13, %c0_14] : memref<32x32xbf16, #tpu.memory_space<vmem>>, vector<32x32xbf16>
    %cst_15 = arith.constant dense<0.000000e+00> : vector<32x32xf32>
    %27 = tpu.matmul %25, %26, %cst_15 {dimension_numbers = #tpu.dot_dimension_numbers<[1], [0], [0], [1], [0, 0, 1, 1], [], []>} : vector<32x32xbf16>, vector<32x32xbf16>, vector<32x32xf32> -> vector<32x32xf32>
    %c0_16 = arith.constant 0 : index
    %c0_17 = arith.constant 0 : index
    %28 = vector.load %arg7[%c0_16, %c0_17] : memref<1x32xf32, #tpu.memory_space<vmem>>, vector<1x32xf32>
    %29 = vector.broadcast %28 : vector<1x32xf32> to vector<32x32xf32>
    %30 = arith.addf %27, %29 : vector<32x32xf32>
    %31 = tpu.iota {dimensions = array<i32: 1>} : vector<32x32xi32>
    %c16_i32 = arith.constant 16 : i32
    %32 = vector.broadcast %c16_i32 : i32 to vector<32x32xi32>
    %33 = arith.cmpi sge, %31, %32 : vector<32x32xi32>
    %34 = math.exp %30 : vector<32x32xf32>
    %35 = arith.select %33, %34, %30 : vector<32x32xi1>, vector<32x32xf32>
    %c0_18 = arith.constant 0 : index
    %c0_19 = arith.constant 0 : index
    %36 = vector.load %arg8[%c0_18, %c0_19] : memref<32x32xf32, #tpu.memory_space<vmem>>, vector<32x32xf32>
    tpu.vector_store %arg8[%c0_18, %c0_19], %35 {strides = array<i32>} : memref<32x32xf32, #tpu.memory_space<vmem>>, vector<32x32xf32>,
    return
  }
  func.func @transform_0(%arg0: i32) -> (i32, i32) {
    %c0_i32 = arith.constant 0 : i32
    %c0_i32_0 = arith.constant 0 : i32
    return %arg0, %c0_i32 : i32, i32
  }
  func.func @transform_1(%arg0: i32) -> (i32, i32) {
    %c0_i32 = arith.constant 0 : i32
    %c0_i32_0 = arith.constant 0 : i32
    return %arg0, %c0_i32 : i32, i32
  }
  func.func @transform_2(%arg0: i32) -> (i32, i32) {
    %c0_i32 = arith.constant 0 : i32
    %c0_i32_0 = arith.constant 0 : i32
    %c0_i32_1 = arith.constant 0 : i32
    return %c0_i32, %c0_i32_0 : i32, i32
  }
  func.func @transform_3(%arg0: i32) -> (i32, i32) {
    %c0_i32 = arith.constant 0 : i32
    %c0_i32_0 = arith.constant 0 : i32
    %c0_i32_1 = arith.constant 0 : i32
    return %c0_i32, %c0_i32_0 : i32, i32
  }
  func.func @transform_4(%arg0: i32) -> (i32, i32) {
    %c0_i32 = arith.constant 0 : i32
    %c0_i32_0 = arith.constant 0 : i32
    %c0_i32_1 = arith.constant 0 : i32
    return %c0_i32, %c0_i32_0 : i32, i32
  }
  func.func @transform_5(%arg0: i32) -> (i32, i32) {
    %c0_i32 = arith.constant 0 : i32
    %c0_i32_0 = arith.constant 0 : i32
    %c0_i32_1 = arith.constant 0 : i32
    return %c0_i32, %c0_i32_0 : i32, i32
  }
  func.func @transform_6(%arg0: i32) -> (i32, i32) {
    %c0_i32 = arith.constant 0 : i32
    %c0_i32_0 = arith.constant 0 : i32
    %c0_i32_1 = arith.constant 0 : i32
    return %c0_i32, %c0_i32_0 : i32, i32
  }
  func.func @transform_7(%arg0: i32) -> (i32, i32) {
    %c0_i32 = arith.constant 0 : i32
    %c0_i32_0 = arith.constant 0 : i32
    return %arg0, %c0_i32 : i32, i32
  }
}

</mosaic_0001>

<bundles_post_ra>
// kernel: forward.1
= control target key start
LH: loop header
LB: loop body
LE: loop exit
PB: predicated region body
PF: predicated region fallthrough
CT: control target
= control target key end

     0   :  { %vm84_vm0 = vcmask 130048   ;;  %v348_v1 = vmov 0   ;;  %vm212_vm1 = vcmask 261120   ;;  %s445_s2 = inlined_call_operand.vmem [shape: bf16[16,32], index: 2, kind: input, shape index: {}]   ;;  %s446_s0 = inlined_call_operand.vmem [shape: bf16[32,16], index: 0, kind: input, shape index: {}]   ;;  %s447_s1 = inlined_call_operand.vmem [shape: f32[32,1], index: 1, kind: input, shape index: {}]   ;;  %s448_s5 = inlined_call_operand.vmem [shape: bf16[32,32], index: 5, kind: input, shape index: {}]   ;;  %s449_s3 = inlined_call_operand.vmem [shape: f32[1,32], index: 3, kind: input, shape index: {}]   ;;  %s450_s4 = inlined_call_operand.vmem [shape: f32[1,32], index: 4, kind: input, shape index: {}]   ;;  %s451_s6 = inlined_call_operand.vmem [shape: f32[1,32], index: 6, kind: input, shape index: {}]   ;;  %s452_s7 = inlined_call_operand.vmem [shape: f32[32,32], index: 7, kind: output, shape index: {}]  }
   0x1   :  { %v327_v0 = vld [vmem:[%s445_s2] sm:$0xff]   ;;  %325 = vset.pattern.permute.xlu0 %v348_v1  ;;  %326 = vset.pattern.permute.xlu1 %v348_v1  ;;  %v329_v3 = vld [vmem:[%s446_s0 + $0x8] sm:$0xff]   ;;  %v35_v5 = vld [vmem:[%s447_s1 + $0x10] sm:$0xff] }
   0x2   :  { %v328_v2 = vld [vmem:[%s446_s0] sm:$0xff]   ;;  %310 = vmatprep.subr.bf16.mxu0 %v327_v0  ;;  %50 = vperm.xlu1 %326, %v35_v5   ;;  %v34_v6 = vld [vmem:[%s447_s1 + $0x8] sm:$0xff]  ;;  %v36_v7 = vld [vmem:[%s447_s1 + $0x18] sm:$0xff] }
   0x3   :  { %311 = vmatpush3.bf16.msra.mxu0 %v327_v0  ;;  %312 = vmatprep.mubr.msk.bf16.mxu0 %vm84_vm0, %v328_v2  ;;  %v33_v4 = vld [vmem:[%s447_s1] sm:$0xff]  ;;  %v330_v8 = vld [vmem:[%s448_s5 + $0x8] sm:$0xff]  }
   0x4   :  { %40 = vperm.xlu0 %325, %v33_v4   ;;  %v331_v9 = vld [vmem:[%s448_s5] sm:$0xff]   ;;  %316 = vmatprep.subr.bf16.mxu1 %v330_v8 }
   0x5   :  { %317 = vmatpush3.bf16.msra.mxu1 %v330_v8  ;;  %v291_v11 = vld [vmem:[%s449_s3] ss:$0 sm:$0xff] }
   0x6   :  { %313 = vmatmul.mubr.msk.bf16.vlgmr.msra.gmra.mxu0 %vm84_vm0, %v329_v3  ;;  %55 = vperm.xlu1 %326, %v36_v7   ;;  %v297_v17 = vld [vmem:[%s450_s4] ss:$0 sm:$0xff] }
   0x7   :  { %318 = vmatprep.subr.bf16.mxu1 %v331_v9 }
   0x8   :  { %45 = vperm.xlu0 %325, %v34_v6   ;;  %v298_v6 = vld [vmem:[%s451_s6] ss:$0 sm:$0xff] }
   0x9   :  { %319 = vmatpush3.bf16.msra.mxu1 %v331_v9 }
  0x7d   :  { %v51_v10 = vpop.permute.xlu1 %50 }
  0x7e   :  { %v66_v13 = vmul.f32 %v291_v11, %v51_v10 }
  0x7f   :  { %v41_v12 = vpop.permute.xlu0 %40 }
  0x80   :  { %v64_v15 = vmul.f32 %v291_v11, %v41_v12 }
  0x81   :  { %v56_v14 = vpop.permute.xlu1 %55 }
  0x82   :  { %v67_v19 = vmul.f32 %v291_v11, %v56_v14 }
  0x83   :  { %v46_v20 = vpop.permute.xlu0 %45 }
  0x84   :  { %v65_v25 = vmul.f32 %v291_v11, %v46_v20 }
  0xc6   :  { %v314_v16 = vpop.f32.mrf.mxu0 }
  0xc7   :  { %v134_v18 = vadd.f32 %v314_v16, %v66_v13 }
  0xc8   :  { %v125_v21 = vpop.f32.mrf.mxu0 }
  0xc9   :  { %v149_v22 = vadd.f32 %v297_v17, %v134_v18  ;;  %v126_v23 = vadd.f32 %v125_v21, %v64_v15  ;;  %v268_v18 = vlaneseq }
  0xca   :  { %v315_v24 = vpop.f32.mrf.mxu0 }
  0xcb   :  { %v153_v26 = vmul.f32 %v149_v22, %v149_v22  ;;  %v147_v27 = vadd.f32 %v297_v17, %v126_v23  ;;  %v137_v28 = vadd.f32 %v315_v24, %v67_v19  ;;  %v269_v20 = vand.u32 127, %v268_v18 }
  0xcc   :  { %v128_v29 = vpop.f32.mrf.mxu0 }
  0xcd   :  { %v157_v30 = vmul.f32 %v153_v26, %v149_v22  ;;  %v151_v31 = vmul.f32 %v147_v27, %v147_v27  ;;  %v150_v32 = vadd.f32 %v297_v17, %v137_v28  ;;  %v129_v33 = vadd.f32 %v128_v29, %v65_v25 }
  0xce   :  { %vm270_vm2 = vcmp.ge.s32.totalorder %v269_v20, 16 }
  0xcf   :  { %v161_v34 = vmul.f32 0.044715, %v157_v30  ;;  %v155_v35 = vmul.f32 %v151_v31, %v147_v27  ;;  %v154_v36 = vmul.f32 %v150_v32, %v150_v32  ;;  %v148_v37 = vadd.f32 %v297_v17, %v129_v33 }
  0xd1   :  { %v165_v38 = vadd.f32 %v161_v34, %v149_v22  ;;  %v159_v39 = vmul.f32 0.044715, %v155_v35  ;;  %v158_v40 = vmul.f32 %v154_v36, %v150_v32  ;;  %v152_v41 = vmul.f32 %v148_v37, %v148_v37 }
  0xd3   :  { %v169_v42 = vmul.f32 0.7978846, %v165_v38  ;;  %v162_v43 = vmul.f32 0.044715, %v158_v40  ;;  %v156_v44 = vmul.f32 %v152_v41, %v148_v37  ;;  %v163_v45 = vadd.f32 %v159_v39, %v147_v27 }
  0xd5   :  { %v166_v46 = vadd.f32 %v162_v43, %v150_v32  ;;  %v160_v47 = vmul.f32 0.044715, %v156_v44  ;;  %v167_v48 = vmul.f32 0.7978846, %v163_v45  ;;  %332 = vtanh.f32 %v169_v42 }
  0xd7   :  { %v170_v49 = vmul.f32 0.7978846, %v166_v46  ;;  %v164_v50 = vadd.f32 %v160_v47, %v148_v37  ;;  %334 = vtanh.f32 %v167_v48 }
  0xd9   :  { %336 = vtanh.f32 %v170_v49  ;;  %v168_v51 = vmul.f32 0.7978846, %v164_v50 }
  0xdb   :  { %338 = vtanh.f32 %v168_v51 }
  0xe2   :  { %v333_v52 = vpop.eup %332 }
  0xe3   :  { %v177_v56 = vadd.f32 1.0, %v333_v52 }
  0xe4   :  { %v335_v53 = vpop.eup %334 }
  0xe5   :  { %v175_v54 = vadd.f32 1.0, %v335_v53  ;;  %v181_v62 = vmul.f32 0.5, %v177_v56 }
  0xe6   :  { %v337_v55 = vpop.eup %336 }
  0xe7   :  { %v178_v57 = vadd.f32 1.0, %v337_v55  ;;  %v179_v60 = vmul.f32 0.5, %v175_v54  ;;  %v185_v3 = vmul.f32 %v181_v62, %v149_v22 }
  0xe8   :  { %v339_v58 = vpop.eup %338 }
  0xe9   :  { %v176_v59 = vadd.f32 1.0, %v339_v58  ;;  %v182_v61 = vmul.f32 0.5, %v178_v57  ;;  %v183_v1 = vmul.f32 %v179_v60, %v147_v27 }
  0xeb   :  { %v180_v63 = vmul.f32 0.5, %v176_v59  ;;  %v186_v0 = vmul.f32 %v182_v61, %v150_v32 }
  0xed   :  { %v184_v2 = vmul.f32 %v180_v63, %v148_v37  ;;  %v188_v5 = vpack.c.bf16 %v186_v0, %v185_v3 }
  0xef   :  { %v187_v4 = vpack.c.bf16 %v184_v2, %v183_v1 }
  0xf1   :  { %320 = vmatprep.mubr.msk.bf16.mxu1 %vm212_vm1, %v187_v4 }
  0xf2   :  { %321 = vmatmul.mubr.msk.bf16.vlgmr.msra.gmra.mxu1 %vm212_vm1, %v188_v5 }
 0x1b2   :  { %v322_v7 = vpop.f32.mrf.mxu1 }
 0x1b3   :  { %v262_v8 = vadd.f32 %v322_v7, %v298_v6 }
 0x1b4   :  { %v253_v9 = vpop.f32.mrf.mxu1 }
 0x1b5   :  { %v275_v10 = vmul.f32 1.442695, %v262_v8  ;;  %v254_v11 = vadd.f32 %v298_v6, %v253_v9 }
 0x1b6   :  { %v323_v12 = vpop.f32.mrf.mxu1 }
 0x1b7   :  { %340 = vpow2.f32 %v275_v10  ;;  %v271_v13 = vmul.f32 1.442695, %v254_v11  ;;  %v265_v14 = vadd.f32 %v323_v12, %v298_v6 }
 0x1b8   :  { %v256_v15 = vpop.f32.mrf.mxu1 }
 0x1b9   :  { %342 = vpow2.f32 %v271_v13  ;;  %v277_v16 = vmul.f32 1.442695, %v265_v14  ;;  %v257_v17 = vadd.f32 %v298_v6, %v256_v15 }
 0x1bb   :  { %344 = vpow2.f32 %v277_v16  ;;  %v273_v19 = vmul.f32 1.442695, %v257_v17 }
 0x1bd   :  { %346 = vpow2.f32 %v273_v19 }
 0x1c4   :  { %v341_v21 = vpop.eup %340 }
 0x1c5   :  { %v281_v22 = vsel %vm270_vm2, %v341_v21, %v262_v8 }
 0x1c6   :  { %v343_v23 = vpop.eup %342  ;;  %285 = vst.msk [vmem:[%s452_s7 + $0x10] sm:$0xff] %vm212_vm1, %v281_v22 }
 0x1c7   :  { %v279_v24 = vsel %vm270_vm2, %v343_v23, %v254_v11 }
 0x1c8   :  { %v345_v25 = vpop.eup %344  ;;  %283 = vst.msk [vmem:[%s452_s7] sm:$0xff] %vm212_vm1, %v279_v24 }
 0x1c9   :  { %v282_v26 = vsel %vm270_vm2, %v345_v25, %v265_v14 }
 0x1ca   :  { %v347_v27 = vpop.eup %346  ;;  %286 = vst.msk [vmem:[%s452_s7 + $0x18] sm:$0xff] %vm212_vm1, %v282_v26 }
 0x1cb   :  { %v280_v28 = vsel %vm270_vm2, %v347_v27, %v257_v17 }
 0x1cc   :  { %284 = vst.msk [vmem:[%s452_s7 + $0x8] sm:$0xff] %vm212_vm1, %v280_v28 }

</bundles_post_ra>
